<compile_context>
chip_gen: v5e
topology: v5e:2x2
jax: 0.10.0
libtpu: 0.0.40
codegen_flags: <defaults>
</compile_context>

<pallas_src>
import functools

import jax
import jax.numpy as jnp
from jax.experimental import pallas as pl
from jax.experimental.pallas import tpu as pltpu


def addnorm_kernel(res_ref, prev_ref, alpha_ref, bias_ref, out_ref, *, eps, features):
    # Residual add; upcast in-register only (VPU).
    x = res_ref[...].astype(jnp.float32) + prev_ref[...].astype(jnp.float32)

    # One-pass reduction: sum(x) and sum(x*x) have no serial dependency, so the
    # two XLU row reductions can overlap, and no `centered` full tile is kept
    # live just for the variance pass.
    sum_x = jnp.sum(x, axis=-1, keepdims=True)
    sum_xx = jnp.sum(x * x, axis=-1, keepdims=True)

    mean = sum_x * (1.0 / features)
    # Unbiased variance (torch.std default, ddof=1): (sum(x^2) - F*mean^2)/(F-1).
    # max(features-1, 1) guards features == 1 (torch would return NaN there).
    # Clamp at 0 against tiny negative rounding before sqrt.
    var = jnp.maximum(sum_xx - sum_x * mean, 0.0) * (1.0 / max(features - 1, 1))
    std = jnp.sqrt(var)

    # Divide -> reciprocal + multiply on a (rows, 1) quantity; exact reciprocal
    # keeps the 1e-5 tolerance of the reference.
    inv = pl.reciprocal(std + eps, approx=False)

    # alpha/bias are pre-cast to f32 in the wrapper; (1, F) blocks stay resident.
    out = (x - mean) * (alpha_ref[...] * inv) + bias_ref[...]
    out_ref[...] = out.astype(out_ref.dtype)


def _tpu_memory_profile():
    """Return (vmem_capacity_bytes, has_two_tensorcores) with a safe fallback."""
    try:
        info = pltpu.get_tpu_info()
        vmem = int(info.vmem_capacity_bytes)
    except Exception:
        vmem = 64 * 2**20  # conservative: fits every current generation
    # v7x: 64 MiB VMEM per TC and 2 TCs/chip; v5e/v6e: 128 MiB and a single TC.
    two_tc = vmem <= 64 * 2**20
    return vmem, two_tc


def _choose_block_rows(batch, features, itemsize, *, vmem_bytes, two_tensorcores):
    """Bandwidth-oriented, bytes-based row-tile selection.

    Budget ~60% of physical VMEM for: double-buffered 2 inputs + 1 output in
    the native dtype plus ~3 full-tile f32 intermediates.  Larger tiles mean
    fewer grid steps, amortizing the ~0.35 us/step overhead (dominant lever
    for this mem-bound kernel).  The ">= 2 grid steps" halving only applies on
    2-TensorCore chips (v7x), where dimension_semantics=('parallel',) actually
    shards the grid across cores.
    """
    sublane = max(8, 32 // itemsize)            # 8 for f32, 16 for bf16
    row_bytes = max(1, features * itemsize)

    budget = (vmem_bytes * 3) // 5              # ~60% of VMEM
    per_row_bytes = 3 * 2 * row_bytes + 3 * features * 4  # pipeline bufs + f32 temps
    br = budget // max(per_row_bytes, 1)
    br = max(sublane, (br // sublane) * sublane)

    if two_tensorcores and batch > sublane:
        # Keep at least two grid steps so both TensorCores get work.
        half = (((batch + 1) // 2 + sublane - 1) // sublane) * sublane
        br = min(br, max(sublane, half))

    padded_batch = pl.cdiv(batch, sublane) * sublane
    br = min(br, padded_batch)
    return int(br)


def add_norm(residual, prev_layer, alpha, bias, *, eps=1e-6, block_rows=None):
    """residual, prev_layer: (B, F); alpha, bias: (F,)."""
    B, F = residual.shape
    assert prev_layer.shape == (B, F)
    assert alpha.shape == (F,) and bias.shape == (F,)

    itemsize = jnp.dtype(residual.dtype).itemsize
    vmem_bytes, two_tc = _tpu_memory_profile()
    br = block_rows if block_rows is not None else _choose_block_rows(
        B, F, itemsize, vmem_bytes=vmem_bytes, two_tensorcores=two_tc)

    # Ragged grid: no host-side padding or output slicing.  The last block may
    # be partial; OOB output rows are dropped by the pipeline and garbage input
    # rows only influence their own dropped output rows (per-row reduction).
    num_blocks = pl.cdiv(B, br)

    # Hoist parameter casts out of the kernel; (1, F) blocks stay VMEM-resident.
    alpha2d = alpha.reshape(1, F).astype(jnp.float32)
    bias2d = bias.reshape(1, F).astype(jnp.float32)

    # VMEM budget: double-buffered 2 inputs + 1 output (native dtype) plus ~3
    # full-tile f32 intermediates, capped at ~75% of physical VMEM
    # (~48 MiB on v7x, ~96 MiB on v5e/v6e).  The explicit limit is mandatory on
    # v5e where the default scoped limit is only 16 MiB.
    tile_elems = br * F
    est = (2 * 2 * tile_elems * itemsize      # double-buffered inputs
           + 2 * tile_elems * itemsize        # double-buffered output
           + 3 * tile_elems * 4               # f32 intermediates
           + 4 * F * 4)                       # params
    vmem_cap = (vmem_bytes * 3) // 4
    vmem_limit = int(min(vmem_cap, max(32 * 2**20, est + 4 * 2**20)))
    # TODO(synk): for extremely wide F (a single sublane-height tile + f32
    # intermediates exceeding vmem_cap) add a feature-split grid axis marked
    # 'arbitrary' that accumulates sum/sumsq before a second normalize pass.

    kernel = functools.partial(addnorm_kernel, eps=eps, features=F)

    out = pl.pallas_call(
        kernel,
        out_shape=jax.ShapeDtypeStruct((B, F), residual.dtype),
        grid_spec=pltpu.PrefetchScalarGridSpec(
            num_scalar_prefetch=0,
            grid=(num_blocks,),
            in_specs=[
                pl.BlockSpec((br, F), lambda i: (i, 0)),
                pl.BlockSpec((br, F), lambda i: (i, 0)),
                pl.BlockSpec((1, F), lambda i: (0, 0)),
                pl.BlockSpec((1, F), lambda i: (0, 0)),
            ],
            out_specs=pl.BlockSpec((br, F), lambda i: (i, 0)),
        ),
        compiler_params=pltpu.CompilerParams(
            dimension_semantics=("parallel",),
            vmem_limit_bytes=vmem_limit,
        ),
    )(residual, prev_layer, alpha2d, bias2d)
    return out


def _reference(residual, prev_layer, alpha, bias, eps):
    X = residual + prev_layer
    mean = jnp.mean(X, axis=1, keepdims=True)
    std = jnp.std(X, axis=1, keepdims=True, ddof=1)  # unbiased, like torch.std
    return alpha * (X - mean) / (std + eps) + bias


if __name__ == "__main__":
    eps = 1e-6
    key = jax.random.PRNGKey(0)

    # Case 1: small lane-aligned shape (batch=8, features=128), auto tiling.
    B, F = 8, 128
    k1, k2, key = jax.random.split(key, 3)
    residual = jax.random.normal(k1, (B, F), dtype=jnp.float32)
    prev_layer = jax.random.normal(k2, (B, F), dtype=jnp.float32)
    alpha = jnp.ones((F,), dtype=jnp.float32)   # nn.Parameter(torch.ones(features))
    bias = jnp.zeros((F,), dtype=jnp.float32)   # nn.Parameter(torch.zeros(features))

    out = jax.block_until_ready(add_norm(residual, prev_layer, alpha, bias, eps=eps))
    ref = _reference(residual, prev_layer, alpha, bias, eps)
    assert jnp.allclose(out, ref, atol=1e-5, rtol=1e-5), "case 1 mismatch vs reference"

    # Case 2: batch not a multiple of the tile, forced small tile -> exercises
    # the ragged (partial) last block without any host-side padding.
    B2, F2 = 20, 256
    k3, k4, key = jax.random.split(key, 3)
    residual2 = jax.random.normal(k3, (B2, F2), dtype=jnp.float32)
    prev_layer2 = jax.random.normal(k4, (B2, F2), dtype=jnp.float32)
    alpha2 = jnp.ones((F2,), dtype=jnp.float32)
    bias2 = jnp.zeros((F2,), dtype=jnp.float32)

    out2 = jax.block_until_ready(
        add_norm(residual2, prev_layer2, alpha2, bias2, eps=eps, block_rows=8))
    ref2 = _reference(residual2, prev_layer2, alpha2, bias2, eps)
    assert jnp.allclose(out2, ref2, atol=1e-5, rtol=1e-5), "case 2 mismatch vs reference"

    # Case 3: same ragged batch, auto tile choice (may be a single partial block).
    out3 = jax.block_until_ready(add_norm(residual2, prev_layer2, alpha2, bias2, eps=eps))
    assert jnp.allclose(out3, ref2, atol=1e-5, rtol=1e-5), "case 3 mismatch vs reference"

    print("KERNEL_OK")
</pallas_src>

<mosaic_0001>
module attributes {stable_mosaic.version = 11 : i64} {
  func.func @addnorm_kernel(%arg0: i32, %arg1: memref<8x128xf32, #tpu.memory_space<vmem>>, %arg2: memref<8x128xf32, #tpu.memory_space<vmem>>, %arg3: memref<1x128xf32, #tpu.memory_space<vmem>>, %arg4: memref<1x128xf32, #tpu.memory_space<vmem>>, %arg5: memref<8x128xf32, #tpu.memory_space<vmem>>) attributes {dimension_semantics = [#tpu.dimension_semantics<parallel>], iteration_bounds = array<i64: 1>, scalar_prefetch = 0 : i64, scratch_operands = 0 : i64, tpu.core_type = #tpu.core_type<tc>, window_params = [{transform_indices = @transform_0, window_bounds = array<i64: 8, 128>}, {transform_indices = @transform_1, window_bounds = array<i64: 8, 128>}, {pipeline_mode = #tpu.pipeline_mode<synchronous>, transform_indices = @transform_2, window_bounds = array<i64: 1, 128>}, {pipeline_mode = #tpu.pipeline_mode<synchronous>, transform_indices = @transform_3, window_bounds = array<i64: 1, 128>}, {transform_indices = @transform_4, window_bounds = array<i64: 8, 128>}]} {
    %c0 = arith.constant 0 : index
    %c0_0 = arith.constant 0 : index
    %0 = vector.load %arg1[%c0, %c0_0] : memref<8x128xf32, #tpu.memory_space<vmem>>, vector<8x128xf32>
    %c0_1 = arith.constant 0 : index
    %c0_2 = arith.constant 0 : index
    %1 = vector.load %arg2[%c0_1, %c0_2] : memref<8x128xf32, #tpu.memory_space<vmem>>, vector<8x128xf32>
    %2 = arith.addf %0, %1 : vector<8x128xf32>
    %cst = arith.constant dense<0.000000e+00> : vector<8xf32>
    %3 = vector.multi_reduction <add>, %2, %cst [1] : vector<8x128xf32> to vector<8xf32>
    %4 = vector.shape_cast %3 : vector<8xf32> to vector<8x1xf32>
    %5 = arith.mulf %2, %2 : vector<8x128xf32>
    %cst_3 = arith.constant dense<0.000000e+00> : vector<8xf32>
    %6 = vector.multi_reduction <add>, %5, %cst_3 [1] : vector<8x128xf32> to vector<8xf32>
    %7 = vector.shape_cast %6 : vector<8xf32> to vector<8x1xf32>
    %cst_4 = arith.constant 7.812500e-03 : f32
    %8 = vector.broadcast %cst_4 : f32 to vector<8x1xf32>
    %9 = arith.mulf %4, %8 : vector<8x1xf32>
    %10 = arith.mulf %4, %9 : vector<8x1xf32>
    %11 = arith.subf %7, %10 : vector<8x1xf32>
    %cst_5 = arith.constant 0.000000e+00 : f32
    %12 = vector.broadcast %cst_5 : f32 to vector<8x1xf32>
    %13 = arith.maximumf %11, %12 : vector<8x1xf32>
    %cst_6 = arith.constant 0.00787401571 : f32
    %14 = vector.broadcast %cst_6 : f32 to vector<8x1xf32>
    %15 = arith.mulf %13, %14 : vector<8x1xf32>
    %16 = math.sqrt %15 : vector<8x1xf32>
    %cst_7 = arith.constant 9.99999997E-7 : f32
    %17 = vector.broadcast %cst_7 : f32 to vector<8x1xf32>
    %18 = arith.addf %16, %17 : vector<8x1xf32>
    %19 = tpu.reciprocal %18 : vector<8x1xf32> -> vector<8x1xf32>
    %20 = vector.broadcast %9 : vector<8x1xf32> to vector<8x128xf32>
    %21 = arith.subf %2, %20 : vector<8x128xf32>
    %c0_8 = arith.constant 0 : index
    %c0_9 = arith.constant 0 : index
    %22 = vector.load %arg3[%c0_8, %c0_9] : memref<1x128xf32, #tpu.memory_space<vmem>>, vector<1x128xf32>
    %23 = vector.broadcast %22 : vector<1x128xf32> to vector<8x128xf32>
    %24 = vector.broadcast %19 : vector<8x1xf32> to vector<8x128xf32>
    %25 = arith.mulf %23, %24 : vector<8x128xf32>
    %26 = arith.mulf %21, %25 : vector<8x128xf32>
    %c0_10 = arith.constant 0 : index
    %c0_11 = arith.constant 0 : index
    %27 = vector.load %arg4[%c0_10, %c0_11] : memref<1x128xf32, #tpu.memory_space<vmem>>, vector<1x128xf32>
    %28 = vector.broadcast %27 : vector<1x128xf32> to vector<8x128xf32>
    %29 = arith.addf %26, %28 : vector<8x128xf32>
    %c0_12 = arith.constant 0 : index
    %c0_13 = arith.constant 0 : index
    %30 = vector.load %arg5[%c0_12, %c0_13] : memref<8x128xf32, #tpu.memory_space<vmem>>, vector<8x128xf32>
    tpu.vector_store %arg5[%c0_12, %c0_13], %29 {strides = array<i32>} : memref<8x128xf32, #tpu.memory_space<vmem>>, vector<8x128xf32>,
    return
  }
  func.func @transform_0(%arg0: i32) -> (i32, i32) {
    %c0_i32 = arith.constant 0 : i32
    %c0_i32_0 = arith.constant 0 : i32
    return %arg0, %c0_i32 : i32, i32
  }
  func.func @transform_1(%arg0: i32) -> (i32, i32) {
    %c0_i32 = arith.constant 0 : i32
    %c0_i32_0 = arith.constant 0 : i32
    return %arg0, %c0_i32 : i32, i32
  }
  func.func @transform_2(%arg0: i32) -> (i32, i32) {
    %c0_i32 = arith.constant 0 : i32
    %c0_i32_0 = arith.constant 0 : i32
    %c0_i32_1 = arith.constant 0 : i32
    return %c0_i32, %c0_i32_0 : i32, i32
  }
  func.func @transform_3(%arg0: i32) -> (i32, i32) {
    %c0_i32 = arith.constant 0 : i32
    %c0_i32_0 = arith.constant 0 : i32
    %c0_i32_1 = arith.constant 0 : i32
    return %c0_i32, %c0_i32_0 : i32, i32
  }
  func.func @transform_4(%arg0: i32) -> (i32, i32) {
    %c0_i32 = arith.constant 0 : i32
    %c0_i32_0 = arith.constant 0 : i32
    return %arg0, %c0_i32 : i32, i32
  }
}

</mosaic_0001>

<bundles_post_ra>
// kernel: tpu_custom_call.1
= control target key start
LH: loop header
LB: loop body
LE: loop exit
PB: predicated region body
PF: predicated region fallthrough
CT: control target
= control target key end

     0   :  { %9 = vsyncpa [#allocation3], 0  ;;  %s247_s0 = inlined_call_operand.hbm [shape: f32[8,128], index: 0, kind: input, shape index: {}]   ;;  %s248_s1 = inlined_call_operand.hbm [shape: f32[8,128], index: 1, kind: input, shape index: {}]   ;;  %s249_s2 = inlined_call_operand.vmem [shape: f32[1,128], index: 2, kind: input, shape index: {}]   ;;  %s250_s3 = inlined_call_operand.vmem [shape: f32[1,128], index: 3, kind: input, shape index: {}]   ;;  %s251_s4 = inlined_call_operand.hbm [shape: f32[8,128], index: 4, kind: output, shape index: {}]  }
   0x1   :  { %10 = vsyncpa [#allocation6], 0 }
   0x2   :  { %11 = vsyncpa [#allocation4], 0  ;;  %s17_s17 = sshll.u32 %s247_s0, 4  ;;  %s204_s18 = smov [#allocation2]   ;;  %s18_s17 = int_to_ptr.hbm [resolvable:$true] %s17_s17 }
   0x3   :  { %s19_s19 = sshll.u32 %s204_s18, 4  ;;  %s28_s22 = sshll.u32 %s248_s1, 4  ;;  %s20_s19 = int_to_ptr.vmem [resolvable:$true] %s19_s19  ;;  %s29_s22 = int_to_ptr.hbm [resolvable:$true] %s28_s22 }
   0x4   :  { %22 = dma.hbm_to_vmem [thread:$0]  %s18_s17, 128, %s20_s19, [#allocation3]  }
   0x5   :  { %s205_s23 = smov [#allocation5]  }
   0x6   :  { %s30_s24 = sshll.u32 %s205_s23, 4  ;;  %s31_s24 = int_to_ptr.vmem [resolvable:$true] %s30_s24 }
   0x7   :  { %33 = dma.hbm_to_vmem [thread:$0]  %s29_s22, 128, %s31_s24, [#allocation6]  }
   0x8   :  { %198 = dma.done.wait [#allocation3], 128  }
   0x9   :  { %199 = vsyncadd [#allocation3], 4294967168 }
   0xa   :  { %200 = dma.done.wait [#allocation6], 128  }
   0xb   :  { %201 = vsyncadd [#allocation6], 4294967168  ;;  %v46_v0 = vld [vmem:[#allocation2] sm:$0xff]  ;;  %v47_v1 = vld [vmem:[#allocation5] sm:$0xff]  ;;  %s206_s27 = smov [#allocation7]   ;;  %s106_s5 = sshll.u32 %s251_s4, 4  ;;  %s107_s5 = int_to_ptr.hbm [resolvable:$true] %s106_s5 }
   0xc   :  { %v48_v2 = vadd.f32 %v47_v1, %v46_v0  ;;  %v120_v29 = vld [vmem:[%s249_s2] ss:$0 sm:$0xff]  ;;  %s104_s28 = sshll.u32 %s206_s27, 4  ;;  %s105_s28 = int_to_ptr.vmem [resolvable:$true] %s104_s28 }
   0xd   :  { %v121_v35 = vld [vmem:[%s250_s3] ss:$0 sm:$0xff] }
   0xe   :  { %49 = vadd.xlane.f32.xlu0 %v48_v2  ;;  %v51_v3 = vmul.f32 %v48_v2, %v48_v2 }
  0x16   :  { %52 = vadd.xlane.f32.xlu0 %v51_v3 }
  0x81   :  { %v50_v4 = vpop.xlane.xlu0 %49 }
  0x82   :  { %v54_v5 = vmul.f32 0.0078125, %v50_v4 }
  0x84   :  { %v55_v6 = vmul.f32 %v54_v5, %v50_v4  ;;  %v86_v33 = vsub.f32 %v48_v2, %v54_v5 }
  0x89   :  { %v53_v7 = vpop.xlane.xlu0 %52 }
  0x8a   :  { %v56_v8 = vsub.f32 %v53_v7, %v55_v6 }
  0x8c   :  { %v57_v9 = vmax.f32 %v56_v8, 0.0 }
  0x8e   :  { %v58_v10 = vmul.f32 0.007874016, %v57_v9 }
  0x90   :  { %122 = vrsqrt.f32 %v58_v10  ;;  %vm66_vm0 = vcmp.eq.f32.partialorder %v58_v10, inf  ;;  %v69_v18 = vand.u32 2147483648, %v58_v10  ;;  %vm68_vm1 = vcmp.eq.f32.partialorder %v58_v10, 0.0 }
  0x96   :  { %v123_v11 = vpop.eup %122 }
  0x97   :  { %v60_v12 = vmul.f32 %v123_v11, %v58_v10 }
  0x99   :  { %v61_v13 = vmul.f32 %v123_v11, %v60_v12 }
  0x9b   :  { %v62_v14 = vmul.f32 0.5, %v61_v13 }
  0x9d   :  { %v63_v15 = vsub.f32 1.5, %v62_v14 }
  0x9f   :  { %v64_v16 = vmul.f32 %v123_v11, %v63_v15 }
  0xa1   :  { %v65_v17 = vmul.f32 %v64_v16, %v58_v10 }
  0xa3   :  { %v67_v19 = vsel %vm66_vm0, %v58_v10, %v65_v17 }
  0xa4   :  { %v70_v20 = vsel %vm68_vm1, %v69_v18, %v67_v19 }
  0xa5   :  { %v71_v21 = vadd.f32 1e-06, %v70_v20 }
  0xa7   :  { %124 = vrcp.f32 %v71_v21  ;;  %v83_v25 = vand.u32 2147483648, %v71_v21  ;;  %v81_v27 = vand.u32 2147483647, %v71_v21  ;;  %vm77_vm3 = vweird.f32 %v71_v21 }
  0xa9   :  { %v84_v30 = vor.u32 1.1754944e-38, %v83_v25  ;;  %vm82_vm5 = vcmp.eq.f32.partialorder %v81_v27, 8.507059e+37 }
  0xad   :  { %v125_v22 = vpop.eup %124 }
  0xae   :  { %v73_v23 = vmul.f32 %v125_v22, %v71_v21  ;;  %vm78_vm2 = vweird.f32 %v125_v22 }
  0xaf   :  { %vm79_vm4 = vmor %vm77_vm3, %vm78_vm2 }
  0xb0   :  { %v74_v24 = vsub.f32 1.0, %v73_v23 }
  0xb2   :  { %v75_v26 = vmul.f32 %v125_v22, %v74_v24 }
  0xb4   :  { %v76_v28 = vadd.f32 %v125_v22, %v75_v26 }
  0xb6   :  { %v80_v31 = vsel %vm79_vm4, %v125_v22, %v76_v28 }
  0xb7   :  { %v85_v32 = vsel %vm82_vm5, %v84_v30, %v80_v31 }
  0xb8   :  { %v91_v34 = vmul.f32 %v120_v29, %v85_v32 }
  0xba   :  { %v92_v36 = vmul.f32 %v91_v34, %v86_v33 }
  0xbc   :  { %v97_v37 = vadd.f32 %v121_v35, %v92_v36 }
  0xbe   :  { %98 = vst [vmem:[#allocation7] sm:$0xff] %v97_v37 }
  0xbf   :  { %109 = dma.vmem_to_hbm [thread:$0]  %s105_s28, 128, %s107_s5, [#allocation4]  }
  0xc0   :  { %202 = dma.done.wait [#allocation4], 128  }
  0xc1   :  { %203 = vsyncadd [#allocation4], 4294967168 }
  0xc2   :  { %114 = vsyncpa [#allocation3], 1 }
  0xc3   :  { %115 = vsyncpa [#allocation6], 1 }
  0xc4   :  { %116 = vsyncpa [#allocation4], 1 }

</bundles_post_ra>
